<compile_context>
chip_gen: v6e
topology: v6e:2x2x1
jax: 0.10.0
libtpu: 0.0.40
codegen_flags: <defaults>
</compile_context>

<pallas_src>
import functools

import jax
import jax.numpy as jnp
from jax import lax
from jax.experimental import pallas as pl
from jax.experimental.pallas import tpu as pltpu


def _graph_feat_kernel(pc_ref, alphas_ref, out_ref, *, eps, threshold,
                       n_weights, n_points):
    """One point cloud -> all n_weights thresholded affinity matrices, concatenated.

    pc_ref:     (N, D)             f32 point cloud (VMEM)
    alphas_ref: (n_weights, D)     f32 learned scalings (VMEM)
    out_ref:    (N, n_weights * N) f32, torch.cat(..., dim=1) layout (VMEM)
    """
    pc = pc_ref[...]                      # (N, D)
    al = alphas_ref[...]                  # (W, D)
    pc2 = pc * pc
    al2 = al * al

    dims = (((1,), (1,)), ((), ()))
    hi = lax.Precision.HIGHEST            # exact-f32 matmuls; MXU has huge headroom here

    # Per-(point, weight) squared norms in both orientations via two tiny MXU
    # calls (replaces 2*n_weights cross-lane XLU reductions):
    #   sq_nw[j, i] = sq_wn[i, j] = || pc_j * a_i ||^2
    sq_nw = lax.dot_general(pc2, al2, dims, precision=hi,
                            preferred_element_type=jnp.float32)    # (N, W)
    sq_wn = lax.dot_general(al2, pc2, dims, precision=hi,
                            preferred_element_type=jnp.float32)    # (W, N)

    # All n_weights Gram matrices from ONE MXU call, already in the concatenated
    # output orientation:  (pc*a_i)(pc*a_i)^T == pc @ (pc * a_i^2)^T, so
    #   g_all[j, i*N + k] = <pc_j * a_i, pc_k * a_i>.
    y = jnp.concatenate([pc * al2[i:i + 1, :] for i in range(n_weights)],
                        axis=0)                                     # (W*N, D)
    g_all = lax.dot_general(pc, y, dims, precision=hi,
                            preferred_element_type=jnp.float32)     # (N, W*N)

    # Broadcast the norm terms to the full (N, W*N) tile (static unroll, tiny W).
    row_term = jnp.concatenate(
        [jnp.broadcast_to(sq_nw[:, i:i + 1], (n_points, n_points))
         for i in range(n_weights)], axis=1)                        # (N, W*N)
    col_term = jnp.concatenate(
        [sq_wn[i:i + 1, :] for i in range(n_weights)], axis=1)      # (1, W*N)

    dist = row_term + col_term - 2.0 * g_all                        # (N, W*N)
    denom = dist + jnp.float32(eps)

    # Reciprocal on the EUP (approx) + one Newton step -> ~f32 accuracy while
    # keeping the exact divide off the VALU critical path.
    r = pl.reciprocal(denom, approx=True)
    w = r * (2.0 - denom * r)

    # Zeroing mask depends only on dist/denom (not on the reciprocal):
    #  * block diagonal + coincident pairs (dist <= 0): structural equivalent of
    #    PyTorch's `W[W == 1/eps] = 0`; also swallows any inf/NaN from denom<=0.
    #  * `w < threshold` rewritten as `denom > 1/threshold`.
    rows = lax.broadcasted_iota(jnp.int32, (n_points, n_weights * n_points), 0)
    cols = lax.broadcasted_iota(jnp.int32, (n_points, n_weights * n_points), 1)
    block_diag = (cols % n_points) == rows
    zero = block_diag | (dist <= 0.0) | (denom > jnp.float32(1.0 / threshold))

    out_ref[...] = jnp.where(zero, jnp.float32(0.0), w)   # single lane-dense store


def graph_feat_learning_forward(point_cloud, alphas, eps, threshold):
    """Pallas implementation of GraphFeatLearningLayer.forward (affinity stage).

    point_cloud: (N, D) or (B, N, D); alphas: (n_weights, D).
    Returns (N, n_weights*N) or (B, N, n_weights*N).
    """
    squeeze = point_cloud.ndim == 2
    pc = point_cloud[None] if squeeze else point_cloud
    batch, n_points, dim = pc.shape
    n_weights, dim2 = alphas.shape
    assert dim == dim2, (point_cloud.shape, alphas.shape)

    kernel = functools.partial(
        _graph_feat_kernel,
        eps=float(eps),
        threshold=float(threshold),
        n_weights=n_weights,
        n_points=n_points,
    )

    out = pl.pallas_call(
        kernel,
        out_shape=jax.ShapeDtypeStruct(
            (batch, n_points, n_weights * n_points), jnp.float32),
        grid=(batch,),                               # batch axis amortizes launch cost
        in_specs=[
            pl.BlockSpec((None, n_points, dim), lambda b: (b, 0, 0)),       # point cloud
            pl.BlockSpec((n_weights, dim), lambda b: (0, 0)),               # alphas (shared)
        ],
        out_specs=pl.BlockSpec((None, n_points, n_weights * n_points),
                               lambda b: (b, 0, 0)),
        compiler_params=pltpu.CompilerParams(
            dimension_semantics=("parallel",)),      # v7x: both TensorCores get work
    )(pc.astype(jnp.float32), alphas.astype(jnp.float32))

    # TODO(synk): GraphWaveletTransform.generate_timepoint_feature() is undefined
    # in the provided source; the concatenated affinities are returned instead.
    return out[0] if squeeze else out


def _reference(point_cloud, alphas, eps, threshold):
    """Pure-JAX, PyTorch-faithful reference (f32, diag(G), W == 1/eps trick)."""
    def one_cloud(pc):
        outs = []
        for i in range(alphas.shape[0]):
            x = pc * alphas[i]
            g = jnp.dot(x, x.T, precision=lax.Precision.HIGHEST)
            d = jnp.diag(g)
            dist = d[None, :] + d[:, None] - 2.0 * g
            w = 1.0 / (dist + eps)
            w = jnp.where(w == 1.0 / eps, 0.0, w)
            w = jnp.where(w < threshold, 0.0, w)
            outs.append(w)
        return jnp.concatenate(outs, axis=1)

    if point_cloud.ndim == 2:
        return one_cloud(point_cloud)
    return jnp.stack([one_cloud(p) for p in point_cloud], axis=0)


if __name__ == "__main__":
    key = jax.random.PRNGKey(0)
    k_pc, k_alpha, k_batch = jax.random.split(key, 3)

    n_points, dim = 16, 8          # point cloud: 16 points in R^8
    n_weights = 4                  # number of learned scaling vectors
    threshold = 1e-4
    # eps chosen as a power of two so PyTorch's `W[W == 1/eps] = 0` value trick
    # is numerically exact in f32 and the faithful reference matches the
    # kernel's structural diagonal/coincident-point rule.
    eps = 2.0 ** -10

    point_cloud = jax.random.normal(k_pc, (n_points, dim), dtype=jnp.float32)
    # nn.Parameter(torch.rand(n_weights, dimension)) -> uniform[0, 1)
    alphas = jax.random.uniform(k_alpha, (n_weights, dim), dtype=jnp.float32)

    # Single point cloud (module's forward signature).
    out = graph_feat_learning_forward(point_cloud, alphas, eps, threshold)
    out = jax.block_until_ready(out)
    ref = _reference(point_cloud, alphas, eps, threshold)
    assert out.shape == (n_points, n_weights * n_points), out.shape
    assert jnp.allclose(out, ref, rtol=1e-3, atol=1e-4), float(
        jnp.max(jnp.abs(out - ref)))

    # Batched path (exercises the "parallel" grid axis / launch amortization).
    pc_batch = jax.random.normal(k_batch, (2, n_points, dim), dtype=jnp.float32)
    out_b = graph_feat_learning_forward(pc_batch, alphas, eps, threshold)
    out_b = jax.block_until_ready(out_b)
    ref_b = _reference(pc_batch, alphas, eps, threshold)
    assert out_b.shape == (2, n_points, n_weights * n_points), out_b.shape
    assert jnp.allclose(out_b, ref_b, rtol=1e-3, atol=1e-4), float(
        jnp.max(jnp.abs(out_b - ref_b)))

    print("KERNEL_OK")
</pallas_src>

<mosaic_0001>
module attributes {stable_mosaic.version = 11 : i64} {
  func.func @_graph_feat_kernel(%arg0: i32, %arg1: memref<1x16x8xf32, #tpu.memory_space<vmem>>, %arg2: memref<4x8xf32, #tpu.memory_space<vmem>>, %arg3: memref<1x16x64xf32, #tpu.memory_space<vmem>>) attributes {dimension_semantics = [#tpu.dimension_semantics<parallel>], iteration_bounds = array<i64: 1>, scalar_prefetch = 0 : i64, scratch_operands = 0 : i64, tpu.core_type = #tpu.core_type<tc>, window_params = [{transform_indices = @transform_0, window_bounds = array<i64: 1, 16, 8>}, {pipeline_mode = #tpu.pipeline_mode<synchronous>, transform_indices = @transform_1, window_bounds = array<i64: 4, 8>}, {transform_indices = @transform_2, window_bounds = array<i64: 1, 16, 64>}]} {
    %c0 = arith.constant 0 : index
    %c0_0 = arith.constant 0 : index
    %c0_1 = arith.constant 0 : index
    %0 = vector.load %arg1[%c0, %c0_0, %c0_1] : memref<1x16x8xf32, #tpu.memory_space<vmem>>, vector<1x16x8xf32>
    %1 = vector.shape_cast %0 : vector<1x16x8xf32> to vector<16x8xf32>
    %c0_2 = arith.constant 0 : index
    %c0_3 = arith.constant 0 : index
    %2 = vector.load %arg2[%c0_2, %c0_3] : memref<4x8xf32, #tpu.memory_space<vmem>>, vector<4x8xf32>
    %3 = arith.mulf %1, %1 : vector<16x8xf32>
    %4 = arith.mulf %2, %2 : vector<4x8xf32>
    %cst = arith.constant dense<0.000000e+00> : vector<16x4xf32>
    %5 = tpu.matmul %3, %4, %cst {dimension_numbers = #tpu.dot_dimension_numbers<[1], [1], [0], [0], [0, 0, 1, 0], [], []>, precision = #tpu.contract_precision<fp32>} : vector<16x8xf32>, vector<4x8xf32>, vector<16x4xf32> -> vector<16x4xf32>
    %cst_4 = arith.constant dense<0.000000e+00> : vector<4x16xf32>
    %6 = tpu.matmul %4, %3, %cst_4 {dimension_numbers = #tpu.dot_dimension_numbers<[1], [1], [0], [0], [0, 0, 1, 0], [], []>, precision = #tpu.contract_precision<fp32>} : vector<4x8xf32>, vector<16x8xf32>, vector<4x16xf32> -> vector<4x16xf32>
    %7 = vector.extract_strided_slice %4 {offsets = [0, 0], sizes = [1, 8], strides = [1, 1]} : vector<4x8xf32> to vector<1x8xf32>
    %8 = vector.broadcast %7 : vector<1x8xf32> to vector<16x8xf32>
    %9 = arith.mulf %1, %8 : vector<16x8xf32>
    %10 = vector.extract_strided_slice %4 {offsets = [1, 0], sizes = [1, 8], strides = [1, 1]} : vector<4x8xf32> to vector<1x8xf32>
    %11 = vector.broadcast %10 : vector<1x8xf32> to vector<16x8xf32>
    %12 = arith.mulf %1, %11 : vector<16x8xf32>
    %13 = vector.extract_strided_slice %4 {offsets = [2, 0], sizes = [1, 8], strides = [1, 1]} : vector<4x8xf32> to vector<1x8xf32>
    %14 = vector.broadcast %13 : vector<1x8xf32> to vector<16x8xf32>
    %15 = arith.mulf %1, %14 : vector<16x8xf32>
    %16 = vector.extract_strided_slice %4 {offsets = [3, 0], sizes = [1, 8], strides = [1, 1]} : vector<4x8xf32> to vector<1x8xf32>
    %17 = vector.broadcast %16 : vector<1x8xf32> to vector<16x8xf32>
    %18 = arith.mulf %1, %17 : vector<16x8xf32>
    %19 = tpu.concatenate %9, %12, %15, %18 in 0 : vector<16x8xf32>, vector<16x8xf32>, vector<16x8xf32>, vector<16x8xf32> -> vector<64x8xf32>
    %cst_5 = arith.constant dense<0.000000e+00> : vector<16x64xf32>
    %20 = tpu.matmul %1, %19, %cst_5 {dimension_numbers = #tpu.dot_dimension_numbers<[1], [1], [0], [0], [0, 0, 1, 0], [], []>, precision = #tpu.contract_precision<fp32>} : vector<16x8xf32>, vector<64x8xf32>, vector<16x64xf32> -> vector<16x64xf32>
    %21 = vector.extract_strided_slice %5 {offsets = [0, 0], sizes = [16, 1], strides = [1, 1]} : vector<16x4xf32> to vector<16x1xf32>
    %22 = vector.shape_cast %21 : vector<16x1xf32> to vector<16x1xf32>
    %23 = vector.broadcast %22 : vector<16x1xf32> to vector<16x16xf32>
    %24 = vector.extract_strided_slice %5 {offsets = [0, 1], sizes = [16, 1], strides = [1, 1]} : vector<16x4xf32> to vector<16x1xf32>
    %25 = vector.shape_cast %24 : vector<16x1xf32> to vector<16x1xf32>
    %26 = vector.broadcast %25 : vector<16x1xf32> to vector<16x16xf32>
    %27 = vector.extract_strided_slice %5 {offsets = [0, 2], sizes = [16, 1], strides = [1, 1]} : vector<16x4xf32> to vector<16x1xf32>
    %28 = vector.shape_cast %27 : vector<16x1xf32> to vector<16x1xf32>
    %29 = vector.broadcast %28 : vector<16x1xf32> to vector<16x16xf32>
    %30 = vector.extract_strided_slice %5 {offsets = [0, 3], sizes = [16, 1], strides = [1, 1]} : vector<16x4xf32> to vector<16x1xf32>
    %31 = vector.shape_cast %30 : vector<16x1xf32> to vector<16x1xf32>
    %32 = vector.broadcast %31 : vector<16x1xf32> to vector<16x16xf32>
    %33 = tpu.concatenate %23, %26, %29, %32 in 1 : vector<16x16xf32>, vector<16x16xf32>, vector<16x16xf32>, vector<16x16xf32> -> vector<16x64xf32>
    %34 = vector.extract_strided_slice %6 {offsets = [0, 0], sizes = [1, 16], strides = [1, 1]} : vector<4x16xf32> to vector<1x16xf32>
    %35 = vector.extract_strided_slice %6 {offsets = [1, 0], sizes = [1, 16], strides = [1, 1]} : vector<4x16xf32> to vector<1x16xf32>
    %36 = vector.extract_strided_slice %6 {offsets = [2, 0], sizes = [1, 16], strides = [1, 1]} : vector<4x16xf32> to vector<1x16xf32>
    %37 = vector.extract_strided_slice %6 {offsets = [3, 0], sizes = [1, 16], strides = [1, 1]} : vector<4x16xf32> to vector<1x16xf32>
    %38 = tpu.concatenate %34, %35, %36, %37 in 1 : vector<1x16xf32>, vector<1x16xf32>, vector<1x16xf32>, vector<1x16xf32> -> vector<1x64xf32>
    %39 = vector.broadcast %38 : vector<1x64xf32> to vector<16x64xf32>
    %40 = arith.addf %33, %39 : vector<16x64xf32>
    %cst_6 = arith.constant 2.000000e+00 : f32
    %41 = vector.broadcast %cst_6 : f32 to vector<16x64xf32>
    %42 = arith.mulf %41, %20 : vector<16x64xf32>
    %43 = arith.subf %40, %42 : vector<16x64xf32>
    %cst_7 = arith.constant 9.765625E-4 : f32
    %44 = vector.broadcast %cst_7 : f32 to vector<16x64xf32>
    %45 = arith.addf %43, %44 : vector<16x64xf32>
    %46 = tpu.reciprocal %45 {approx = true} : vector<16x64xf32> -> vector<16x64xf32>
    %47 = arith.mulf %45, %46 : vector<16x64xf32>
    %cst_8 = arith.constant 2.000000e+00 : f32
    %48 = vector.broadcast %cst_8 : f32 to vector<16x64xf32>
    %49 = arith.subf %48, %47 : vector<16x64xf32>
    %50 = arith.mulf %46, %49 : vector<16x64xf32>
    %51 = tpu.iota {dimensions = array<i32: 0>} : vector<16x64xi32>
    %52 = tpu.iota {dimensions = array<i32: 1>} : vector<16x64xi32>
    %c16_i32 = arith.constant 16 : i32
    %c0_i32 = arith.constant 0 : i32
    %53 = arith.cmpi eq, %c16_i32, %c0_i32 : i32
    %c1_i32 = arith.constant 1 : i32
    %54 = arith.select %53, %c1_i32, %c16_i32 : i32
    %55 = vector.broadcast %54 : i32 to vector<16x64xi32>
    %56 = arith.remsi %52, %55 : vector<16x64xi32>
    %c0_i32_9 = arith.constant 0 : i32
    %57 = vector.broadcast %c0_i32_9 : i32 to vector<16x64xi32>
    %58 = arith.cmpi ne, %56, %57 : vector<16x64xi32>
    %c0_i32_10 = arith.constant 0 : i32
    %59 = vector.broadcast %c0_i32_10 : i32 to vector<16x64xi32>
    %60 = arith.cmpi slt, %56, %59 : vector<16x64xi32>
    %c0_i32_11 = arith.constant 0 : i32
    %61 = arith.cmpi slt, %54, %c0_i32_11 : i32
    %62 = vector.broadcast %61 : i1 to vector<16x64xi1>
    %63 = vector.broadcast %62 : vector<16x64xi1> to vector<16x64xi1>
    %64 = arith.xori %60, %63 : vector<16x64xi1>
    %65 = arith.andi %64, %58 : vector<16x64xi1>
    %66 = vector.broadcast %54 : i32 to vector<16x64xi32>
    %67 = arith.addi %56, %66 : vector<16x64xi32>
    %68 = arith.select %65, %67, %56 : vector<16x64xi1>, vector<16x64xi32>
    %69 = arith.cmpi eq, %68, %51 : vector<16x64xi32>
    %cst_12 = arith.constant 0.000000e+00 : f32
    %70 = vector.broadcast %cst_12 : f32 to vector<16x64xf32>
    %71 = arith.cmpf ole, %43, %70 : vector<16x64xf32>
    %72 = arith.ori %69, %71 : vector<16x64xi1>
    %cst_13 = arith.constant 1.000000e+04 : f32
    %73 = vector.broadcast %cst_13 : f32 to vector<16x64xf32>
    %74 = arith.cmpf ogt, %45, %73 : vector<16x64xf32>
    %75 = arith.ori %72, %74 : vector<16x64xi1>
    %cst_14 = arith.constant 0.000000e+00 : f32
    %76 = vector.broadcast %cst_14 : f32 to vector<16x64xf32>
    %77 = arith.select %75, %76, %50 : vector<16x64xi1>, vector<16x64xf32>
    %c0_15 = arith.constant 0 : index
    %c0_16 = arith.constant 0 : index
    %c0_17 = arith.constant 0 : index
    %78 = vector.load %arg3[%c0_15, %c0_16, %c0_17] : memref<1x16x64xf32, #tpu.memory_space<vmem>>, vector<1x16x64xf32>
    %79 = vector.shape_cast %78 : vector<1x16x64xf32> to vector<16x64xf32>
    %80 = vector.shape_cast %77 : vector<16x64xf32> to vector<1x16x64xf32>
    tpu.vector_store %arg3[%c0_15, %c0_16, %c0_17], %80 {strides = array<i32>} : memref<1x16x64xf32, #tpu.memory_space<vmem>>, vector<1x16x64xf32>,
    return
  }
  func.func @transform_0(%arg0: i32) -> (i32, i32, i32) {
    %c0_i32 = arith.constant 0 : i32
    %c0_i32_0 = arith.constant 0 : i32
    %c0_i32_1 = arith.constant 0 : i32
    return %arg0, %c0_i32, %c0_i32_0 : i32, i32, i32
  }
  func.func @transform_1(%arg0: i32) -> (i32, i32) {
    %c0_i32 = arith.constant 0 : i32
    %c0_i32_0 = arith.constant 0 : i32
    %c0_i32_1 = arith.constant 0 : i32
    return %c0_i32, %c0_i32_0 : i32, i32
  }
  func.func @transform_2(%arg0: i32) -> (i32, i32, i32) {
    %c0_i32 = arith.constant 0 : i32
    %c0_i32_0 = arith.constant 0 : i32
    %c0_i32_1 = arith.constant 0 : i32
    return %arg0, %c0_i32, %c0_i32_0 : i32, i32, i32
  }
}

</mosaic_0001>

<bundles_post_ra>
// kernel: tpu_custom_call.1
= control target key start
LH: loop header
LB: loop body
LE: loop exit
PB: predicated region body
PF: predicated region fallthrough
CT: control target
= control target key end

     0   :  { %vm18_vm0 = vcmask 64512   ;;  %s2434_s0 = inlined_call_operand.vmem [shape: f32[1,16,8], index: 0, kind: input, shape index: {}]   ;;  %s2435_s1 = inlined_call_operand.vmem [shape: f32[4,8], index: 1, kind: input, shape index: {}]   ;;  %s2436_s2 = inlined_call_operand.hbm [shape: f32[1,16,64], index: 2, kind: output, shape index: {}]  }
   0x1   :  { %v14_v0 = vld [vmem:[%s2435_s1] sm:$0xf]  ;;  %v2104_v2 = vld [vmem:[%s2434_s0 + $0x8] sm:$0xff] }
   0x2   :  { %v2099_v1 = vld [vmem:[%s2434_s0] sm:$0xff]  ;;  %v2106_v3 = vmul.f32 %v14_v0, %v14_v0  ;;  %v16_v5 = vmul.f32 %v2104_v2, %v2104_v2 }
   0x3   :  { %v15_v4 = vmul.f32 %v2099_v1, %v2099_v1 }
   0x4   :  { %7 = vsyncpa [#allocation3], 0  ;;  %v2114_v6 = vsel %vm18_vm0, %v2104_v2, 0  ;;  %v26_v7 = vsel %vm18_vm0, %v2106_v3, 0  ;;  %v23_v9 = vsel %vm18_vm0, %v16_v5, 0  ;;  %v976_v13 = vlaneseq  ;;  %s2072_s0 = smov 16  }
   0x5   :  { %v20_v8 = vsel %vm18_vm0, %v15_v4, 0  ;;  %v2120_v10 = vand.u32 4294901760, %v26_v7  ;;  %v2124_v12 = vand.u32 4294901760, %v23_v9  ;;  %v2066_v31 = vmov 0.0   ;;  %s2073_s1 = smov 48   ;;  %s2074_s15 = smov 32  }
   0x6   :  { %v2122_v11 = vand.u32 4294901760, %v20_v8  ;;  %v2146_v20 = vshrl.u32 %v976_v13, 7  ;;  %vm2067_vm1 = vmmov 0   ;;  %v1001_v35 = vsel %vm18_vm0, %v2099_v1, 0  ;;  %s2075_s16 = smov [#allocation2]  }
   0x7   :  { %1833 = vmatprep.subr.mxu0 %v2120_v10  ;;  %v2131_v15 = vsub.f32 %v26_v7, %v2120_v10  ;;  %v105_v16 = vsub.f32 %v23_v9, %v2124_v12  ;;  %v2193_v40 = vand.u32 4294901760, %v1001_v35  ;;  %vm1644_vm2 = vcmask 130048   ;;  %s1726_s17 = sshll.u32 %s2075_s16, 4  ;;  %s1727_s17 = int_to_ptr.vmem [resolvable:$true] %s1726_s17 }
   0x8   :  { %v2128_v14 = vsub.f32 %v20_v8, %v2122_v11  ;;  %1840 = vmatprep.mubr.f32.mxu1 %v2122_v11  ;;  %1834 = vmatpush3.xpose.msra.mxu0 %v2120_v10  ;;  %v996_v27 = vsub.s32 3, %v2146_v20  ;;  %v990_v30 = vsub.s32 2, %v2146_v20  ;;  %v984_v36 = vsub.s32 1, %v2146_v20  ;;  %s2044_s18 = scalar_lea.vmem %s1727_s17, 256  ;;  %p2049_p1 = scmp.lt.s32.totalorder %s1727_s17, %s1727_s17 }
   0x9   :  { %v2140_v18 = vand.u32 4294901760, %v2131_v15  ;;  %1843 = vmatprep.subr.mxu0 %v2131_v15  ;;  %v2143_v19 = vand.u32 4294901760, %v105_v16  ;;  %v2208_v46 = vsub.f32 %v1001_v35, %v2193_v40  ;;  %v978_v52 = vsub.s32 0, %v2146_v20  ;;  %p2045_p0 = scmp.ne.s32.totalorder %s1727_s17, %s2044_s18  ;;  %p2050_p2 = scmp.lt.s32.totalorder %s2044_s18, %s2044_s18 }
   0xa   :  { %v2137_v17 = vand.u32 4294901760, %v2128_v14  ;;  %v997_v28 = vrot.slane %v2106_v3, %v996_v27  ;;  %v991_v34 = vrot.slane %v2106_v3, %v990_v30  ;;  %v985_v41 = vrot.slane %v2106_v3, %v984_v36 }
   0xb   :  { %v148_v22 = vsub.f32 %v2131_v15, %v2140_v18  ;;  %v107_v23 = vsub.f32 %v105_v16, %v2143_v19  ;;  %v1105_v53 = vand.u32 4294901760, %v2208_v46  ;;  %v979_v60 = vrot.slane %v2106_v3, %v978_v52  ;;  %p2051_p3 = por %p2050_p2, %p2049_p1 }
   0xc   :  { %v97_v21 = vsub.f32 %v2128_v14, %v2137_v17  ;;  %v999_v29 = vmul.f32 %v997_v28, %v2104_v2  ;;  %v998_v33 = vmul.f32 %v997_v28, %v2099_v1  ;;  %v993_v39 = vmul.f32 %v991_v34, %v2104_v2 }
   0xd   :  { %v149_v25 = vand.u32 4294901760, %v148_v22  ;;  %v108_v26 = vand.u32 4294901760, %v107_v23  ;;  %v992_v44 = vmul.f32 %v991_v34, %v2099_v1  ;;  %v987_v47 = vmul.f32 %v985_v41, %v2104_v2  ;;  %p2052_p4 = pnand %p2051_p3, %p2045_p0 }
   0xe   :  { %v98_v24 = vand.u32 4294901760, %v97_v21  ;;  %v1028_v32 = vsel %vm18_vm0, %v999_v29, 0  ;;  %v1025_v38 = vsel %vm18_vm0, %v998_v33, 0  ;;  %v1022_v45 = vsel %vm18_vm0, %v993_v39, 0 }
   0xf   :  { %1838 = vmatprep.subr.mxu1 %v149_v25  ;;  %v2188_v37 = vand.u32 4294901760, %v1028_v32  ;;  %v2197_v42 = vand.u32 4294901760, %v1025_v38  ;;  %v2220_v49 = vand.u32 4294901760, %v1022_v45  ;;  %v1019_v51 = vsel %vm18_vm0, %v992_v44, 0 }
  0x10   :  { %1835 = vmatprep.mubr.f32.mxu0 %v98_v24  ;;  %1839 = vmatpush3.xpose.msra.mxu1 %v149_v25  ;;  %v2231_v54 = vand.u32 4294901760, %v1019_v51  ;;  %v1016_v58 = vsel %vm18_vm0, %v987_v47, 0  ;;  %v986_v59 = vmul.f32 %v985_v41, %v2099_v1  ;;  %v1106_v61 = vsub.f32 %v2208_v46, %v1105_v53 }
  0x11   :  { %1836 = vmatmul.mubr.f32.vlgmr.msra.gmra.mxu0 %v108_v26  ;;  %1848 = vmatprep.subr.mxu1 %v2120_v10  ;;  %v2200_v43 = vsub.f32 %v1028_v32, %v2188_v37  ;;  %v2223_v50 = vsub.f32 %v1025_v38, %v2197_v42  ;;  %v2241_v57 = vsub.f32 %v1022_v45, %v2220_v49  ;;  %v2258_v62 = vand.u32 4294901760, %v1016_v58 }
  0x12   :  { %1844 = vmatpush3.xpose.msra.mxu0 %v2131_v15  ;;  %1845 = vmatprep.mubr.f32.mxu0 %v2128_v14  ;;  %v2268_v4 = vsub.f32 %v1019_v51, %v2231_v54  ;;  %v1013_v5 = vsel %vm18_vm0, %v986_v59, 0  ;;  %v981_v7 = vmul.f32 %v979_v60, %v2104_v2  ;;  %v1107_v8 = vand.u32 4294901760, %v1106_v61 }
  0x13   :  { %1853 = vmatprep.subr.mxu0 %v2140_v18  ;;  %1841 = vmatmul.mubr.f32.vlgmr.msra.gmra.mxu1 %v2124_v12  ;;  %v2218_v48 = vand.u32 4294901760, %v2200_v43  ;;  %v2238_v56 = vand.u32 4294901760, %v2223_v50  ;;  %v2265_v3 = vand.u32 4294901760, %v2241_v57  ;;  %v2276_v9 = vsub.f32 %v1016_v58, %v2258_v62 }
  0x14   :  { %1849 = vmatpush3.xpose.msra.mxu1 %v2120_v10  ;;  %1850 = vmatprep.mubr.f32.mxu1 %v2137_v17  ;;  %v1010_v2 = vsel %vm18_vm0, %v981_v7, 0  ;;  %v2317_v27 = vand.u32 4294901760, %v2114_v6  ;;  %v2069_v45 = vmov 0   ;;  %vm1647_vm3 = vcmask 261120  }
  0x15   :  { %1846 = vmatmul.mubr.f32.vlgmr.msra.gmra.mxu0 %v105_v16  ;;  %1858 = vmatprep.subr.mxu1 %v2120_v10  ;;  %v1143_v55 = vsub.f32 %v2200_v43, %v2218_v48  ;;  %v1150_v0 = vsub.f32 %v2223_v50, %v2238_v56  ;;  %v2297_v21 = vand.u32 4294901760, %v1010_v2  ;;  %vm1650_vm4 = vcmask 392192  }
  0x16   :  { %1854 = vmatpush3.xpose.msra.mxu0 %v2140_v18  ;;  %1855 = vmatprep.mubr.f32.mxu0 %v2122_v11  ;;  %v2331_v32 = vsub.f32 %v2114_v6, %v2317_v27  ;;  %vm1718_vm13 = vcmask 523264  }
  0x17   :  { %1851 = vmatmul.mubr.f32.vlgmr.msra.gmra.mxu1 %v2143_v19  ;;  %1863 = vmatprep.subr.mxu0 %v2066_v31  ;;  %v1144_v63 = vand.u32 4294901760, %v1143_v55 }
  0x18   :  { %1859 = vmatpush3.xpose.msra.mxu1 %v2120_v10  ;;  %1860 = vmatprep.mubr.f32.mxu1 %v2122_v11  ;;  %v1115_v36 = vand.u32 4294901760, %v2331_v32 }
  0x19   :  { %1856 = vmatmul.mubr.f32.vlgmr.msra.gmra.mxu0 %v2124_v12  ;;  %1870 = vmatprep.subr.mxu1 %v2066_v31 }
  0x1a   :  { %1864 = vmatpush3.xpose.msra.mxu0 %v2124_v12  ;;  %1867 = vmatprep.mubr.msk.f32.mxu0 %vm2067_vm1, %v2066_v31  ;;  %v1116_v39 = vsub.f32 %v2331_v32, %v1115_v36 }
  0x1b   :  { %1865 = vmatprep.subr.mxu0 %v2066_v31  ;;  %1861 = vmatmul.mubr.f32.vlgmr.msra.gmra.mxu1 %v2124_v12 }
  0x1c   :  { %1871 = vmatpush3.xpose.msra.mxu1 %v108_v26  ;;  %1874 = vmatprep.mubr.msk.f32.mxu1 %vm2067_vm1, %v2066_v31  ;;  %v2313_v26 = vsub.f32 %v1010_v2, %v2297_v21  ;;  %v1117_v44 = vand.u32 4294901760, %v1116_v39 }
  0x1d   :  { %1872 = vmatprep.subr.mxu1 %v2066_v31  ;;  %2031 = vset.pattern.permute.xlu0 %v2069_v45 }
  0x1e   :  { %1866 = vmatpush3.xpose.msra.mxu0 %v2122_v11  ;;  %v2323_v30 = vand.u32 4294901760, %v2313_v26 }
  0x1f   :  { %1877 = vmatprep.subr.mxu0 %v2066_v31 }
  0x20   :  { %1873 = vmatpush3.xpose.msra.mxu1 %v98_v24  ;;  %v1185_v34 = vsub.f32 %v2313_v26, %v2323_v30 }
  0x21   :  { %1868 = vmatmul.mubr.f32.vlgmr.msra.gmra.mxu0 %v149_v25  ;;  %1884 = vmatprep.subr.mxu1 %v2066_v31 }
  0x22   :  { %1878 = vmatpush3.xpose.msra.mxu0 %v105_v16  ;;  %1881 = vmatprep.mubr.msk.f32.mxu0 %vm2067_vm1, %v2066_v31  ;;  %v2284_v16 = vand.u32 4294901760, %v1013_v5  ;;  %v1186_v6 = vand.u32 4294901760, %v1185_v34 }
  0x23   :  { %1879 = vmatprep.subr.mxu0 %v2066_v31  ;;  %1875 = vmatmul.mubr.f32.vlgmr.msra.gmra.mxu1 %v2120_v10 }
  0x24   :  { %1885 = vmatpush3.xpose.msra.mxu1 %v2124_v12  ;;  %1888 = vmatprep.mubr.msk.f32.mxu1 %vm2067_vm1, %v2066_v31 }
  0x25   :  { %1886 = vmatprep.subr.mxu1 %v2066_v31 }
  0x26   :  { %1880 = vmatpush3.xpose.msra.mxu0 %v2128_v14  ;;  %v1157_v14 = vsub.f32 %v2241_v57, %v2265_v3 }
  0x27   :  { %1891 = vmatprep.subr.mxu0 %v2066_v31 }
  0x28   :  { %1887 = vmatpush3.xpose.msra.mxu1 %v2122_v11 }
  0x29   :  { %1882 = vmatmul.mubr.f32.vlgmr.msra.gmra.mxu0 %v2131_v15  ;;  %1898 = vmatprep.subr.mxu1 %v2066_v31  ;;  %v2282_v15 = vand.u32 4294901760, %v2268_v4 }
  0x2a   :  { %1892 = vmatpush3.xpose.msra.mxu0 %v2143_v19  ;;  %1895 = vmatprep.mubr.msk.f32.mxu0 %vm2067_vm1, %v2066_v31 }
  0x2b   :  { %1893 = vmatprep.subr.mxu0 %v2066_v31  ;;  %1889 = vmatmul.mubr.f32.vlgmr.msra.gmra.mxu1 %v2140_v18  ;;  %v1158_v18 = vand.u32 4294901760, %v1157_v14  ;;  %v1164_v19 = vsub.f32 %v2268_v4, %v2282_v15 }
  0x2c   :  { %1899 = vmatpush3.xpose.msra.mxu1 %v2124_v12  ;;  %1902 = vmatprep.mubr.msk.f32.mxu1 %vm2067_vm1, %v2066_v31  ;;  %v1151_v12 = vand.u32 4294901760, %v1150_v0 }
  0x2d   :  { %1900 = vmatprep.subr.mxu1 %v2066_v31  ;;  %v1165_v23 = vand.u32 4294901760, %v1164_v19 }
  0x2e   :  { %1894 = vmatpush3.xpose.msra.mxu0 %v2137_v17  ;;  %v2291_v17 = vand.u32 4294901760, %v2276_v9 }
  0x2f   :  { %1905 = vmatprep.subr.mxu0 %v2188_v37 }
  0x30   :  { %1901 = vmatpush3.xpose.msra.mxu1 %v2122_v11  ;;  %v980_v11 = vmul.f32 %v979_v60, %v2099_v1  ;;  %v2300_v1 = vsub.f32 %v1013_v5, %v2284_v16  ;;  %v1171_v22 = vsub.f32 %v2276_v9, %v2291_v17  ;;  %v2071_v5 = vmov 3  }
  0x31   :  { %1896 = vmatmul.mubr.f32.vlgmr.msra.gmra.mxu0 %v2120_v10  ;;  %1924 = vmatprep.subr.mxu1 %v1144_v63 }
  0x32   :  { %1906 = vmatpush3.xpose.msra.mxu0 %v2188_v37  ;;  %1921 = vmatprep.mubr.f32.mxu0 %v1107_v8  ;;  %v2308_v24 = vand.u32 4294901760, %v2300_v1  ;;  %v1172_v28 = vand.u32 4294901760, %v1171_v22 }
  0x33   :  { %1907 = vmatprep.subr.mxu0 %v2197_v42  ;;  %1903 = vmatmul.mubr.f32.vlgmr.msra.gmra.mxu1 %v2120_v10  ;;  %v1007_v10 = vsel %vm18_vm0, %v980_v11, 0 }
  0x34   :  { %1925 = vmatpush3.xpose.msra.mxu1 %v1144_v63  ;;  %1940 = vmatprep.mubr.f32.mxu1 %v2193_v40  ;;  %v2310_v25 = vand.u32 4294901760, %v1007_v10  ;;  %v1178_v29 = vsub.f32 %v2300_v1, %v2308_v24 }
  0x35   :  { %1926 = vmatprep.subr.mxu1 %v1151_v12 }
  0x36   :  { %1908 = vmatpush3.xpose.msra.mxu0 %v2197_v42  ;;  %v2326_v31 = vsub.f32 %v1007_v10, %v2310_v25  ;;  %v1179_v33 = vand.u32 4294901760, %v1178_v29 }
  0x37   :  { %1909 = vmatprep.subr.mxu0 %v2220_v49 }
  0x38   :  { %1927 = vmatpush3.xpose.msra.mxu1 %v1151_v12  ;;  %v2337_v35 = vand.u32 4294901760, %v2326_v31 }
  0x39   :  { %1928 = vmatprep.subr.mxu1 %v1158_v18 }
  0x3a   :  { %1910 = vmatpush3.xpose.msra.mxu0 %v2220_v49  ;;  %v1192_v38 = vsub.f32 %v2326_v31, %v2337_v35 }
  0x3b   :  { %1911 = vmatprep.subr.mxu0 %v2231_v54 }
  0x3c   :  { %1929 = vmatpush3.xpose.msra.mxu1 %v1158_v18  ;;  %v1193_v41 = vand.u32 4294901760, %v1192_v38 }
  0x3d   :  { %1930 = vmatprep.subr.mxu1 %v1165_v23 }
  0x3e   :  { %1912 = vmatpush3.xpose.msra.mxu0 %v2231_v54 }
  0x3f   :  { %1913 = vmatprep.subr.mxu0 %v2258_v62 }
  0x40   :  { %1931 = vmatpush3.xpose.msra.mxu1 %v1165_v23 }
  0x41   :  { %1932 = vmatprep.subr.mxu1 %v1172_v28 }
  0x42   :  { %1914 = vmatpush3.xpose.msra.mxu0 %v2258_v62 }
  0x43   :  { %1915 = vmatprep.subr.mxu0 %v2284_v16 }
  0x44   :  { %1933 = vmatpush3.xpose.msra.mxu1 %v1172_v28 }
  0x45   :  { %1934 = vmatprep.subr.mxu1 %v1179_v33 }
  0x46   :  { %1916 = vmatpush3.xpose.msra.mxu0 %v2284_v16 }
  0x47   :  { %1917 = vmatprep.subr.mxu0 %v2297_v21 }
  0x48   :  { %1935 = vmatpush3.xpose.msra.mxu1 %v1179_v33 }
  0x49   :  { %1936 = vmatprep.subr.mxu1 %v1186_v6 }
  0x4a   :  { %1918 = vmatpush3.xpose.msra.mxu0 %v2297_v21 }
  0x4b   :  { %1919 = vmatprep.subr.mxu0 %v2310_v25 }
  0x4c   :  { %1937 = vmatpush3.xpose.msra.mxu1 %v1186_v6 }
  0x4d   :  { %1938 = vmatprep.subr.mxu1 %v1193_v41 }
  0x4e   :  { %1920 = vmatpush3.xpose.msra.mxu0 %v2310_v25 }
  0x4f   :  { %1943 = vmatprep.subr.mxu0 %v2200_v43 }
  0x50   :  { %1939 = vmatpush3.xpose.msra.mxu1 %v1193_v41 }
  0x51   :  { %1922 = vmatmul.mubr.f32.vlgmr.msra.gmra.mxu0 %v1117_v44  ;;  %1962 = vmatprep.subr.mxu1 %v2188_v37 }
  0x52   :  { %1944 = vmatpush3.xpose.msra.mxu0 %v2200_v43  ;;  %1959 = vmatprep.mubr.f32.mxu0 %v2208_v46  ;;  %v2068_v43 = vmov 1  }
  0x53   :  { %1945 = vmatprep.subr.mxu0 %v2223_v50  ;;  %1941 = vmatmul.mubr.f32.vlgmr.msra.gmra.mxu1 %v2317_v27 }
  0x54   :  { %1963 = vmatpush3.xpose.msra.mxu1 %v2188_v37  ;;  %1978 = vmatprep.mubr.f32.mxu1 %v1105_v53 }
  0x55   :  { %1964 = vmatprep.subr.mxu1 %v2197_v42  ;;  %2032 = vset.pattern.permute.xlu1 %v2068_v43 }
  0x56   :  { %1946 = vmatpush3.xpose.msra.mxu0 %v2223_v50 }
  0x57   :  { %1947 = vmatprep.subr.mxu0 %v2241_v57 }
  0x58   :  { %1965 = vmatpush3.xpose.msra.mxu1 %v2197_v42 }
  0x59   :  { %1966 = vmatprep.subr.mxu1 %v2220_v49 }
  0x5a   :  { %1948 = vmatpush3.xpose.msra.mxu0 %v2241_v57 }
  0x5b   :  { %1949 = vmatprep.subr.mxu0 %v2268_v4 }
  0x5c   :  { %1967 = vmatpush3.xpose.msra.mxu1 %v2220_v49 }
  0x5d   :  { %1968 = vmatprep.subr.mxu1 %v2231_v54 }
  0x5e   :  { %1950 = vmatpush3.xpose.msra.mxu0 %v2268_v4  ;;  %v2070_v4 = vmov 2  }
  0x5f   :  { %1951 = vmatprep.subr.mxu0 %v2276_v9 }
  0x60   :  { %1969 = vmatpush3.xpose.msra.mxu1 %v2231_v54 }
  0x61   :  { %1970 = vmatprep.subr.mxu1 %v2258_v62 }
  0x62   :  { %1952 = vmatpush3.xpose.msra.mxu0 %v2276_v9 }
  0x63   :  { %1953 = vmatprep.subr.mxu0 %v2300_v1 }
  0x64   :  { %1971 = vmatpush3.xpose.msra.mxu1 %v2258_v62 }
  0x65   :  { %1972 = vmatprep.subr.mxu1 %v2284_v16 }
  0x66   :  { %1954 = vmatpush3.xpose.msra.mxu0 %v2300_v1 }
  0x67   :  { %1955 = vmatprep.subr.mxu0 %v2313_v26 }
  0x68   :  { %1973 = vmatpush3.xpose.msra.mxu1 %v2284_v16 }
  0x69   :  { %1974 = vmatprep.subr.mxu1 %v2297_v21 }
  0x6a   :  { %1956 = vmatpush3.xpose.msra.mxu0 %v2313_v26 }
  0x6b   :  { %1957 = vmatprep.subr.mxu0 %v2326_v31 }
  0x6c   :  { %1975 = vmatpush3.xpose.msra.mxu1 %v2297_v21 }
  0x6d   :  { %1976 = vmatprep.subr.mxu1 %v2310_v25 }
  0x6e   :  { %1958 = vmatpush3.xpose.msra.mxu0 %v2326_v31 }
  0x6f   :  { %1981 = vmatprep.subr.mxu0 %v2218_v48 }
  0x70   :  { %1977 = vmatpush3.xpose.msra.mxu1 %v2310_v25 }
  0x71   :  { %1960 = vmatmul.mubr.f32.vlgmr.msra.gmra.mxu0 %v2331_v32  ;;  %2000 = vmatprep.subr.mxu1 %v2188_v37 }
  0x72   :  { %1982 = vmatpush3.xpose.msra.mxu0 %v2218_v48  ;;  %1997 = vmatprep.mubr.f32.mxu0 %v2193_v40 }
  0x73   :  { %1983 = vmatprep.subr.mxu0 %v2238_v56  ;;  %1979 = vmatmul.mubr.f32.vlgmr.msra.gmra.mxu1 %v1115_v36 }
  0x74   :  { %2001 = vmatpush3.xpose.msra.mxu1 %v2188_v37  ;;  %2016 = vmatprep.mubr.f32.mxu1 %v2193_v40 }
  0x75   :  { %2002 = vmatprep.subr.mxu1 %v2197_v42 }
  0x76   :  { %1984 = vmatpush3.xpose.msra.mxu0 %v2238_v56 }
  0x77   :  { %1985 = vmatprep.subr.mxu0 %v2265_v3 }
  0x78   :  { %2003 = vmatpush3.xpose.msra.mxu1 %v2197_v42 }
  0x79   :  { %2004 = vmatprep.subr.mxu1 %v2220_v49 }
  0x7a   :  { %1986 = vmatpush3.xpose.msra.mxu0 %v2265_v3 }
  0x7b   :  { %1987 = vmatprep.subr.mxu0 %v2282_v15 }
  0x7c   :  { %2005 = vmatpush3.xpose.msra.mxu1 %v2220_v49 }
  0x7d   :  { %2006 = vmatprep.subr.mxu1 %v2231_v54 }
  0x7e   :  { %1988 = vmatpush3.xpose.msra.mxu0 %v2282_v15 }
  0x7f   :  { %1989 = vmatprep.subr.mxu0 %v2291_v17 }
  0x80   :  { %2007 = vmatpush3.xpose.msra.mxu1 %v2231_v54 }
  0x81   :  { %2008 = vmatprep.subr.mxu1 %v2258_v62 }
  0x82   :  { %1990 = vmatpush3.xpose.msra.mxu0 %v2291_v17 }
  0x83   :  { %1991 = vmatprep.subr.mxu0 %v2308_v24 }
  0x84   :  { %2009 = vmatpush3.xpose.msra.mxu1 %v2258_v62 }
  0x85   :  { %2010 = vmatprep.subr.mxu1 %v2284_v16 }
  0x86   :  { %1992 = vmatpush3.xpose.msra.mxu0 %v2308_v24 }
  0x87   :  { %1993 = vmatprep.subr.mxu0 %v2323_v30 }
  0x88   :  { %2011 = vmatpush3.xpose.msra.mxu1 %v2284_v16 }
  0x89   :  { %2012 = vmatprep.subr.mxu1 %v2297_v21 }
  0x8a   :  { %1994 = vmatpush3.xpose.msra.mxu0 %v2323_v30 }
  0x8b   :  { %1995 = vmatprep.subr.mxu0 %v2337_v35 }
  0x8c   :  { %2013 = vmatpush3.xpose.msra.mxu1 %v2297_v21 }
  0x8d   :  { %2014 = vmatprep.subr.mxu1 %v2310_v25 }
  0x8e   :  { %1996 = vmatpush3.xpose.msra.mxu0 %v2337_v35 }
  0x90   :  { %2015 = vmatpush3.xpose.msra.mxu1 %v2310_v25 }
  0x91   :  { %1998 = vmatmul.mubr.f32.vlgmr.msra.gmra.mxu0 %v2317_v27 }
  0x93   :  { %2017 = vmatmul.mubr.f32.vlgmr.msra.gmra.mxu1 %v2317_v27 }
  0xd1   :  { %v1837_v37 = vpop.f32.mrf.mxu0 }
  0xd3   :  { %v100_v40 = vpop.f32.mrf.mxu0  ;;  %v1842_v42 = vpop.f32.mrf.mxu1 }
  0xd4   :  { %v193_v46 = vadd.f32 %v1842_v42, %v1837_v37 }
  0xd5   :  { %v1847_v47 = vpop.f32.mrf.mxu0  ;;  %v186_v48 = vpop.f32.mrf.mxu1 }
  0xd6   :  { %v274_v49 = vadd.f32 %v1847_v47, %v193_v46  ;;  %v187_v50 = vadd.f32 %v186_v48, %v100_v40 }
  0xd7   :  { %v266_v51 = vpop.f32.mrf.mxu0  ;;  %v1852_v53 = vpop.f32.mrf.mxu1 }
  0xd8   :  { %v356_v54 = vadd.f32 %v1852_v53, %v274_v49  ;;  %v267_v57 = vadd.f32 %v266_v51, %v187_v50 }
  0xd9   :  { %v1857_v55 = vpop.f32.mrf.mxu0  ;;  %v347_v56 = vpop.f32.mrf.mxu1 }
  0xda   :  { %v436_v58 = vadd.f32 %v1857_v55, %v356_v54  ;;  %v348_v61 = vadd.f32 %v347_v56, %v267_v57 }
  0xdb   :  { %v1862_v59 = vpop.f32.mrf.mxu1  ;;  %v429_v62 = vpop.f32.mrf.mxu0 }
  0xdc   :  { %v514_v60 = vadd.f32 %v1862_v59, %v436_v58  ;;  %v430_v3 = vadd.f32 %v429_v62, %v348_v61 }
  0xdd   :  { %v507_v0 = vpop.f32.mrf.mxu1 }
  0xde   :  { %1625 = vperm.xlu1 %2032, %v514_v60   ;;  %1617 = vperm.xlu0 %2031, %v514_v60   ;;  %v508_v12 = vadd.f32 %v507_v0, %v430_v3 }
  0xe1   :  { %v590_v63 = vpop.f32.mrf.mxu0 }
  0xe2   :  { %2033 = vset.pattern.permute.xlu1 %v2070_v4  ;;  %2034 = vset.pattern.permute.xlu0 %v2071_v5 }
  0xe3   :  { %v1869_v7 = vpop.f32.mrf.mxu0  ;;  %1633 = vperm.xlu1 %2033, %v514_v60   ;;  %1641 = vperm.xlu0 %2034, %v514_v60   ;;  %v671_v8 = vpop.f32.mrf.mxu1 }
  0xe4   :  { %v672_v15 = vadd.f32 %v671_v8, %v590_v63 }
  0xe5   :  { %v1876_v9 = vpop.f32.mrf.mxu1 }
  0xe7   :  { %2036 = vset.pattern.permute.xlu1 %v2068_v43  ;;  %2035 = vset.pattern.permute.xlu0 %v2069_v45 }
  0xe8   :  { %1621 = vperm.xlu1 %2036, %v508_v12   ;;  %1612 = vperm.xlu0 %2035, %v508_v12  }
  0xe9   :  { %v747_v14 = vpop.f32.mrf.mxu0 }
  0xea   :  { %v748_v17 = vadd.f32 %v747_v14, %v672_v15 }
  0xeb   :  { %v1883_v16 = vpop.f32.mrf.mxu0  ;;  %v822_v2 = vpop.f32.mrf.mxu1 }
  0xec   :  { %2038 = vset.pattern.permute.xlu1 %v2071_v5  ;;  %2037 = vset.pattern.permute.xlu0 %v2070_v4  ;;  %v823_v18 = vadd.f32 %v822_v2, %v748_v17 }
  0xed   :  { %1637 = vperm.xlu1 %2038, %v508_v12   ;;  %1629 = vperm.xlu0 %2037, %v508_v12   ;;  %v1890_v11 = vpop.f32.mrf.mxu1 }
  0xf1   :  { %v899_v19 = vpop.f32.mrf.mxu0  ;;  %2039 = vset.pattern.permute.xlu0 %v2071_v5 }
  0xf2   :  { %v900_v21 = vadd.f32 %v899_v19, %v823_v18  ;;  %v1693_v18 = vand.u32 127, %v976_v13 }
  0xf3   :  { %v1897_v1 = vpop.f32.mrf.mxu0  ;;  %v972_v10 = vpop.f32.mrf.mxu1 }
  0xf4   :  { %v973_v22 = vadd.f32 %v972_v10, %v900_v21  ;;  %v1698_v19 = vand.u32 15, %v1693_v18  ;;  %v1691_v21 = vadd.s32 8, %v2146_v20 }
  0xf5   :  { %v1904_v23 = vpop.f32.mrf.mxu1 }
  0xf6   :  { %v1654_v24 = vrot.slane %v973_v22, 1  ;;  %v1662_v25 = vrot.slane %v973_v22, 3  ;;  %v1658_v26 = vrot.slane %v973_v22, 2  ;;  %vm1706_vm6 = vcmp.eq.s32.totalorder %v1698_v19, %v2146_v20 }
  0xf7   :  { %vm1707_vm8 = vcmp.eq.s32.totalorder %v1698_v19, %v1691_v21 }
  0xf8   :  { %1655 = vrot.lane.b32.xlu1 %v1654_v24, %s2072_s0  ;;  %1663 = vrot.lane.b32.xlu0 %v1662_v25, %s2073_s1 }
  0xfc   :  { %1659 = vrot.lane.b32.xlu1 %v1658_v26, %s2074_s15 }
 0x111   :  { %v1923_v29 = vpop.f32.mrf.mxu0 }
 0x113   :  { %v1942_v30 = vpop.f32.mrf.mxu1  ;;  %v1109_v31 = vpop.f32.mrf.mxu0 }
 0x114   :  { %v1237_v38 = vadd.f32 %v1942_v30, %v1923_v29 }
 0x115   :  { %v1230_v34 = vpop.f32.mrf.mxu1 }
 0x116   :  { %v1231_v44 = vadd.f32 %v1230_v34, %v1109_v31 }
 0x131   :  { %v1961_v35 = vpop.f32.mrf.mxu0 }
 0x132   :  { %v1332_v45 = vadd.f32 %v1961_v35, %v1237_v38 }
 0x133   :  { %v1980_v36 = vpop.f32.mrf.mxu1  ;;  %v1324_v41 = vpop.f32.mrf.mxu0 }
 0x134   :  { %v1325_v46 = vadd.f32 %v1324_v41, %v1231_v44  ;;  %v1421_v48 = vadd.f32 %v1980_v36, %v1332_v45 }
 0x135   :  { %v1412_v43 = vpop.f32.mrf.mxu1 }
 0x136   :  { %v1413_v51 = vadd.f32 %v1412_v43, %v1325_v46 }
 0x151   :  { %v1999_v37 = vpop.f32.mrf.mxu0 }
 0x152   :  { %v1522_v53 = vadd.f32 %v1999_v37, %v1421_v48 }
 0x153   :  { %v2018_v42 = vpop.f32.mrf.mxu1  ;;  %v1515_v49 = vpop.f32.mrf.mxu0 }
 0x154   :  { %v1516_v55 = vadd.f32 %v1515_v49, %v1413_v51  ;;  %v1607_v56 = vadd.f32 %v2018_v42, %v1522_v53 }
 0x155   :  { %v1600_v54 = vpop.f32.mrf.mxu1 }
 0x156   :  { %v1601_v61 = vadd.f32 %v1600_v54, %v1516_v55  ;;  %v1676_v9 = vmul.f32 2.0, %v1607_v56 }
 0x158   :  { %v1675_v12 = vmul.f32 2.0, %v1601_v61 }
 0x159   :  { %v1626_v27 = vpop.permute.xlu1 %1625  ;;  %v1618_v28 = vpop.permute.xlu0 %1617 }
 0x15a   :  { %v1646_v57 = vsel %vm1644_vm2, %v1618_v28, %v1626_v27 }
 0x15e   :  { %v1634_v32 = vpop.permute.xlu1 %1633  ;;  %v1642_v33 = vpop.permute.xlu0 %1641 }
 0x15f   :  { %v1649_v62 = vsel %vm1647_vm3, %v1646_v57, %v1634_v32 }
 0x160   :  { %v1652_v7 = vsel %vm1650_vm4, %v1649_v62, %v1642_v33 }
 0x163   :  { %v1622_v6 = vpop.permute.xlu1 %1621  ;;  %v1613_v39 = vpop.permute.xlu0 %1612 }
 0x164   :  { %v1645_v58 = vsel %vm1644_vm2, %v1613_v39, %v1622_v6 }
 0x168   :  { %v1638_v40 = vpop.permute.xlu1 %1637  ;;  %v1630_v47 = vpop.permute.xlu0 %1629 }
 0x169   :  { %v1648_v63 = vsel %vm1647_vm3, %v1645_v58, %v1630_v47 }
 0x16a   :  { %v1651_v8 = vsel %vm1650_vm4, %v1648_v63, %v1638_v40 }
 0x16c   :  { %v1656_v50 = vpop.permute.xlu1 %1655  ;;  %v1664_v0 = vpop.permute.xlu0 %1663 }
 0x16d   :  { %v1666_v59 = vsel %vm1644_vm2, %v973_v22, %v1656_v50 }
 0x170   :  { %v1660_v60 = vpop.permute.xlu1 %1659 }
 0x171   :  { %v1667_v3 = vsel %vm1647_vm3, %v1666_v59, %v1660_v60 }
 0x172   :  { %v1668_v4 = vsel %vm1650_vm4, %v1667_v3, %v1664_v0 }
 0x173   :  { %v1672_v5 = vrot.slane %v1668_v4, %v978_v52 }
 0x175   :  { %v1673_v14 = vadd.f32 %v1672_v5, %v1651_v8  ;;  %v1674_v15 = vadd.f32 %v1672_v5, %v1652_v7 }
 0x177   :  { %v1677_v16 = vsub.f32 %v1673_v14, %v1675_v12  ;;  %v1678_v2 = vsub.f32 %v1674_v15, %v1676_v9 }
 0x179   :  { %v1679_v11 = vadd.f32 0.0009765625, %v1677_v16  ;;  %v1680_v17 = vadd.f32 0.0009765625, %v1678_v2  ;;  %vm1708_vm5 = vcmp.le.f32.partialorder %v1677_v16, 0.0  ;;  %vm1709_vm7 = vcmp.le.f32.partialorder %v1678_v2, 0.0 }
 0x17a   :  { %vm1710_vm9 = vmor %vm1706_vm6, %vm1708_vm5 }
 0x17b   :  { %2040 = vrcp.f32 %v1679_v11  ;;  %vm1712_vm10 = vcmp.gt.f32.partialorder %v1679_v11, 10000.0  ;;  %vm1711_vm11 = vmor %vm1707_vm8, %vm1709_vm7  ;;  %vm1713_vm12 = vcmp.gt.f32.partialorder %v1680_v17, 10000.0 }
 0x17c   :  { %2042 = vrcp.f32 %v1680_v17  ;;  %vm1714_vm14 = vmor %vm1710_vm9, %vm1712_vm10 }
 0x17d   :  { %vm1715_vm15 = vmor %vm1711_vm11, %vm1713_vm12 }
 0x188   :  { %v2041_v1 = vpop.eup %2040 }
 0x189   :  { %v2043_v52 = vpop.eup %2042  ;;  %v1683_v10 = vmul.f32 %v2041_v1, %v1679_v11 }
 0x18a   :  { %v1684_v22 = vmul.f32 %v2043_v52, %v1680_v17 }
 0x18b   :  { %v1685_v23 = vsub.f32 2.0, %v1683_v10 }
 0x18c   :  { %v1686_v24 = vsub.f32 2.0, %v1684_v22 }
 0x18d   :  { %v1687_v13 = vmul.f32 %v2041_v1, %v1685_v23 }
 0x18e   :  { %v1688_v25 = vmul.f32 %v2043_v52, %v1686_v24 }
 0x18f   :  { %v1716_v20 = vsel %vm1714_vm14, 0.0, %v1687_v13 }
 0x190   :  { %v1717_v26 = vsel %vm1715_vm15, 0.0, %v1688_v25  ;;  %1719 = vst.msk [vmem:[#allocation2] sm:$0xff] %vm1718_vm13, %v1716_v20 }
 0x191   :  { %1720 = vst.msk [vmem:[#allocation2 + $0x8] sm:$0xff] %vm1718_vm13, %v1717_v26 }
 0x192   :  { %2055 = shalt.err (!%p2052_p4)
}
 0x193   :  { %s2076_s19 = smov 128   ;;  %s2077_s20 = smov 8  }
 0x194   :  { %1732 = dma.vmem_to_hbm [thread:$0]  %s1727_s17, 256, %s2436_s2, [#allocation3], %s2076_s19, %s2076_s19, %s2077_s20  }
 0x195   :  { %2064 = dma.done.wait [#allocation3], 256  }
 0x196   :  { %2065 = vsyncadd [#allocation3], 4294967040 }
 0x197   :  { %1736 = vsyncpa [#allocation3], 1 }

</bundles_post_ra>
